<compile_context>
chip_gen: v6e
topology: v6e:2x2x1
jax: 0.10.0
libtpu: 0.0.40
codegen_flags: <defaults>
</compile_context>

<pallas_src>
import functools

import jax
import jax.numpy as jnp
from jax.experimental import pallas as pl
from jax.experimental.pallas import tpu as pltpu

SEED = 17
LANE = 128      # TPU vreg lane width
SUBLANE = 16    # bf16 sublane packing


def _round_up(n, m):
    return ((n + m - 1) // m) * m


def _mlp_kernel(n_layers, *refs):
    """Fused MLP forward for one batch tile.

    refs = (x_ref, w1_ref, b1_ref, ..., wL_ref, bL_ref, out_ref)

    Weights arrive pre-transposed (in_f, out_f) in bf16, biases in f32.
    Each matmul runs on the MXU in bf16 with an f32 accumulator; the
    elementwise epilogue (bias, ReLU, sigmoid) runs in f32.  Hidden layers
    use ReLU (dropout == identity in eval mode); the final layer uses sigmoid.
    """
    x_ref = refs[0]
    out_ref = refs[-1]
    param_refs = refs[1:-1]

    h = x_ref[...]                               # bf16 (TILE_B, in_pad)
    for layer in range(n_layers):
        w_ref = param_refs[2 * layer]            # bf16 (in_pad, out_pad)
        b_ref = param_refs[2 * layer + 1]        # f32  (1, out_pad)
        z = jnp.dot(h, w_ref[...], preferred_element_type=jnp.float32)
        z = z + b_ref[...]
        if layer < n_layers - 1:
            h = jnp.maximum(z, 0.0).astype(jnp.bfloat16)   # ReLU, back to bf16
        else:
            out_ref[...] = jax.nn.sigmoid(z).astype(out_ref.dtype)


def mlp_forward(x, weights, biases, *, tile_b=256):
    """Run the fused MLP Pallas kernel.

    x:       (B, n_input) float32
    weights: list of (out_f, in_f) float32 arrays (torch nn.Linear layout)
    biases:  list of (out_f,) float32 arrays
    returns: (B, 1) float32, sigmoid probabilities
    """
    n_layers = len(weights)
    B, n_in = x.shape

    # Lane-dense padding (zero padding is mathematically exact here).
    in_pad = _round_up(n_in, LANE)
    out_pads = [_round_up(w.shape[0], LANE) for w in weights]

    tile_b = min(tile_b, _round_up(B, SUBLANE))
    B_pad = _round_up(B, tile_b)

    x_p = jnp.zeros((B_pad, in_pad), jnp.bfloat16)
    x_p = x_p.at[:B, :n_in].set(x.astype(jnp.bfloat16))

    # Wrapper-side layout plumbing: transpose to (in, out), pad, cast to bf16.
    operands = [x_p]
    prev_pad = in_pad
    for w, b, o_pad in zip(weights, biases, out_pads):
        o_f, i_f = w.shape
        w_t = jnp.zeros((prev_pad, o_pad), jnp.bfloat16)
        w_t = w_t.at[:i_f, :o_f].set(w.T.astype(jnp.bfloat16))
        b_p = jnp.zeros((1, o_pad), jnp.float32)
        b_p = b_p.at[0, :o_f].set(b)
        operands.append(w_t)
        operands.append(b_p)
        prev_pad = o_pad

    final_pad = out_pads[-1]
    grid = (B_pad // tile_b,)

    # x / out are batch-tiled; weights & biases keep block index (0, 0) so they
    # are loaded once and stay VMEM-resident across the batch grid.
    in_specs = [pl.BlockSpec((tile_b, in_pad), lambda i: (i, 0))]
    for op in operands[1:]:
        in_specs.append(pl.BlockSpec(op.shape, lambda i: (0, 0)))
    out_spec = pl.BlockSpec((tile_b, final_pad), lambda i: (i, 0))

    kernel = functools.partial(_mlp_kernel, n_layers)

    out_padded = pl.pallas_call(
        kernel,
        out_shape=jax.ShapeDtypeStruct((B_pad, final_pad), jnp.float32),
        grid=grid,
        in_specs=in_specs,
        out_specs=out_spec,
        compiler_params=pltpu.CompilerParams(
            dimension_semantics=("parallel",)),
    )(*operands)

    out_f = weights[-1].shape[0]
    return out_padded[:B, :out_f]


def init_mlp_params(key, n_input, n_hidden):
    """Deterministic PyTorch-style (uniform +-1/sqrt(fan_in)) init."""
    dims = [n_input] + list(n_hidden) + [1]
    weights, biases = [], []
    for i in range(len(dims) - 1):
        fan_in, fan_out = dims[i], dims[i + 1]
        key, kw, kb = jax.random.split(key, 3)
        bound = 1.0 / jnp.sqrt(jnp.float32(fan_in))
        w = jax.random.uniform(kw, (fan_out, fan_in), jnp.float32, -bound, bound)
        b = jax.random.uniform(kb, (fan_out,), jnp.float32, -bound, bound)
        weights.append(w)
        biases.append(b)
    return weights, biases


def mlp_reference_f32(x, weights, biases):
    """Pure-JAX f32 reference matching the PyTorch forward (eval mode)."""
    h = x
    for i, (w, b) in enumerate(zip(weights, biases)):
        z = h @ w.T + b
        h = jnp.maximum(z, 0.0) if i < len(weights) - 1 else jax.nn.sigmoid(z)
    return h


def mlp_reference_bf16(x, weights, biases):
    """Pure-JAX reference with the same bf16-matmul / f32-epilogue recipe."""
    h = x.astype(jnp.bfloat16)
    for i, (w, b) in enumerate(zip(weights, biases)):
        z = jnp.dot(h, w.T.astype(jnp.bfloat16),
                    preferred_element_type=jnp.float32) + b
        if i < len(weights) - 1:
            h = jnp.maximum(z, 0.0).astype(jnp.bfloat16)
        else:
            h = jax.nn.sigmoid(z)
    return h


if __name__ == "__main__":
    # Small shapes consistent with the module: batch=16, n_input=32,
    # n_hidden=[64, 32], n_output=1.
    B, n_input = 16, 32
    n_hidden = [64, 32]

    key = jax.random.PRNGKey(0)
    key_x, _ = jax.random.split(key)
    x = jax.random.normal(key_x, (B, n_input), dtype=jnp.float32)

    weights, biases = init_mlp_params(jax.random.PRNGKey(SEED), n_input, n_hidden)

    out = mlp_forward(x, weights, biases)
    out = jax.block_until_ready(out)

    assert out.shape == (B, 1), out.shape

    # Tight check vs. a reference using the same bf16-matmul recipe.
    ref_bf16 = mlp_reference_bf16(x, weights, biases)
    assert jnp.allclose(out, ref_bf16, atol=1e-3, rtol=0), (
        float(jnp.max(jnp.abs(out - ref_bf16))))

    # Loose check vs. the full-f32 PyTorch-equivalent forward (bf16 matmul
    # introduces small, bounded error on the sigmoid output).
    ref_f32 = mlp_reference_f32(x, weights, biases)
    assert jnp.allclose(out, ref_f32, atol=2e-2, rtol=0), (
        float(jnp.max(jnp.abs(out - ref_f32))))

    print("KERNEL_OK")
</pallas_src>

<mosaic_0001>
module attributes {stable_mosaic.version = 11 : i64} {
  func.func @_mlp_kernel(%arg0: i32, %arg1: memref<16x128xbf16, #tpu.memory_space<vmem>>, %arg2: memref<128x128xbf16, #tpu.memory_space<vmem>>, %arg3: memref<1x128xf32, #tpu.memory_space<vmem>>, %arg4: memref<128x128xbf16, #tpu.memory_space<vmem>>, %arg5: memref<1x128xf32, #tpu.memory_space<vmem>>, %arg6: memref<128x128xbf16, #tpu.memory_space<vmem>>, %arg7: memref<1x128xf32, #tpu.memory_space<vmem>>, %arg8: memref<16x128xf32, #tpu.memory_space<vmem>>) attributes {dimension_semantics = [#tpu.dimension_semantics<parallel>], iteration_bounds = array<i64: 1>, scalar_prefetch = 0 : i64, scratch_operands = 0 : i64, tpu.core_type = #tpu.core_type<tc>, window_params = [{transform_indices = @transform_0, window_bounds = array<i64: 16, 128>}, {pipeline_mode = #tpu.pipeline_mode<synchronous>, transform_indices = @transform_1, window_bounds = array<i64: 128, 128>}, {pipeline_mode = #tpu.pipeline_mode<synchronous>, transform_indices = @transform_2, window_bounds = array<i64: 1, 128>}, {pipeline_mode = #tpu.pipeline_mode<synchronous>, transform_indices = @transform_3, window_bounds = array<i64: 128, 128>}, {pipeline_mode = #tpu.pipeline_mode<synchronous>, transform_indices = @transform_4, window_bounds = array<i64: 1, 128>}, {pipeline_mode = #tpu.pipeline_mode<synchronous>, transform_indices = @transform_5, window_bounds = array<i64: 128, 128>}, {pipeline_mode = #tpu.pipeline_mode<synchronous>, transform_indices = @transform_6, window_bounds = array<i64: 1, 128>}, {transform_indices = @transform_7, window_bounds = array<i64: 16, 128>}]} {
    %c0 = arith.constant 0 : index
    %c0_0 = arith.constant 0 : index
    %0 = vector.load %arg1[%c0, %c0_0] : memref<16x128xbf16, #tpu.memory_space<vmem>>, vector<16x128xbf16>
    %c0_1 = arith.constant 0 : index
    %c0_2 = arith.constant 0 : index
    %1 = vector.load %arg2[%c0_1, %c0_2] : memref<128x128xbf16, #tpu.memory_space<vmem>>, vector<128x128xbf16>
    %cst = arith.constant dense<0.000000e+00> : vector<16x128xf32>
    %2 = tpu.matmul %0, %1, %cst {dimension_numbers = #tpu.dot_dimension_numbers<[1], [0], [0], [1], [0, 0, 1, 1], [], []>} : vector<16x128xbf16>, vector<128x128xbf16>, vector<16x128xf32> -> vector<16x128xf32>
    %c0_3 = arith.constant 0 : index
    %c0_4 = arith.constant 0 : index
    %3 = vector.load %arg3[%c0_3, %c0_4] : memref<1x128xf32, #tpu.memory_space<vmem>>, vector<1x128xf32>
    %4 = vector.broadcast %3 : vector<1x128xf32> to vector<16x128xf32>
    %5 = arith.addf %2, %4 : vector<16x128xf32>
    %cst_5 = arith.constant 0.000000e+00 : f32
    %6 = vector.broadcast %cst_5 : f32 to vector<16x128xf32>
    %7 = arith.maximumf %5, %6 : vector<16x128xf32>
    %8 = arith.truncf %7 : vector<16x128xf32> to vector<16x128xbf16>
    %c0_6 = arith.constant 0 : index
    %c0_7 = arith.constant 0 : index
    %9 = vector.load %arg4[%c0_6, %c0_7] : memref<128x128xbf16, #tpu.memory_space<vmem>>, vector<128x128xbf16>
    %cst_8 = arith.constant dense<0.000000e+00> : vector<16x128xf32>
    %10 = tpu.matmul %8, %9, %cst_8 {dimension_numbers = #tpu.dot_dimension_numbers<[1], [0], [0], [1], [0, 0, 1, 1], [], []>} : vector<16x128xbf16>, vector<128x128xbf16>, vector<16x128xf32> -> vector<16x128xf32>
    %c0_9 = arith.constant 0 : index
    %c0_10 = arith.constant 0 : index
    %11 = vector.load %arg5[%c0_9, %c0_10] : memref<1x128xf32, #tpu.memory_space<vmem>>, vector<1x128xf32>
    %12 = vector.broadcast %11 : vector<1x128xf32> to vector<16x128xf32>
    %13 = arith.addf %10, %12 : vector<16x128xf32>
    %cst_11 = arith.constant 0.000000e+00 : f32
    %14 = vector.broadcast %cst_11 : f32 to vector<16x128xf32>
    %15 = arith.maximumf %13, %14 : vector<16x128xf32>
    %16 = arith.truncf %15 : vector<16x128xf32> to vector<16x128xbf16>
    %c0_12 = arith.constant 0 : index
    %c0_13 = arith.constant 0 : index
    %17 = vector.load %arg6[%c0_12, %c0_13] : memref<128x128xbf16, #tpu.memory_space<vmem>>, vector<128x128xbf16>
    %cst_14 = arith.constant dense<0.000000e+00> : vector<16x128xf32>
    %18 = tpu.matmul %16, %17, %cst_14 {dimension_numbers = #tpu.dot_dimension_numbers<[1], [0], [0], [1], [0, 0, 1, 1], [], []>} : vector<16x128xbf16>, vector<128x128xbf16>, vector<16x128xf32> -> vector<16x128xf32>
    %c0_15 = arith.constant 0 : index
    %c0_16 = arith.constant 0 : index
    %19 = vector.load %arg7[%c0_15, %c0_16] : memref<1x128xf32, #tpu.memory_space<vmem>>, vector<1x128xf32>
    %20 = vector.broadcast %19 : vector<1x128xf32> to vector<16x128xf32>
    %21 = arith.addf %18, %20 : vector<16x128xf32>
    %22 = arith.negf %21 : vector<16x128xf32>
    %23 = math.exp %22 : vector<16x128xf32>
    %cst_17 = arith.constant 1.000000e+00 : f32
    %24 = vector.broadcast %cst_17 : f32 to vector<16x128xf32>
    %25 = arith.addf %24, %23 : vector<16x128xf32>
    %26 = arith.divf %24, %25 : vector<16x128xf32>
    %c0_18 = arith.constant 0 : index
    %c0_19 = arith.constant 0 : index
    %27 = vector.load %arg8[%c0_18, %c0_19] : memref<16x128xf32, #tpu.memory_space<vmem>>, vector<16x128xf32>
    tpu.vector_store %arg8[%c0_18, %c0_19], %26 {strides = array<i32>} : memref<16x128xf32, #tpu.memory_space<vmem>>, vector<16x128xf32>,
    return
  }
  func.func @transform_0(%arg0: i32) -> (i32, i32) {
    %c0_i32 = arith.constant 0 : i32
    %c0_i32_0 = arith.constant 0 : i32
    return %arg0, %c0_i32 : i32, i32
  }
  func.func @transform_1(%arg0: i32) -> (i32, i32) {
    %c0_i32 = arith.constant 0 : i32
    %c0_i32_0 = arith.constant 0 : i32
    %c0_i32_1 = arith.constant 0 : i32
    return %c0_i32, %c0_i32_0 : i32, i32
  }
  func.func @transform_2(%arg0: i32) -> (i32, i32) {
    %c0_i32 = arith.constant 0 : i32
    %c0_i32_0 = arith.constant 0 : i32
    %c0_i32_1 = arith.constant 0 : i32
    return %c0_i32, %c0_i32_0 : i32, i32
  }
  func.func @transform_3(%arg0: i32) -> (i32, i32) {
    %c0_i32 = arith.constant 0 : i32
    %c0_i32_0 = arith.constant 0 : i32
    %c0_i32_1 = arith.constant 0 : i32
    return %c0_i32, %c0_i32_0 : i32, i32
  }
  func.func @transform_4(%arg0: i32) -> (i32, i32) {
    %c0_i32 = arith.constant 0 : i32
    %c0_i32_0 = arith.constant 0 : i32
    %c0_i32_1 = arith.constant 0 : i32
    return %c0_i32, %c0_i32_0 : i32, i32
  }
  func.func @transform_5(%arg0: i32) -> (i32, i32) {
    %c0_i32 = arith.constant 0 : i32
    %c0_i32_0 = arith.constant 0 : i32
    %c0_i32_1 = arith.constant 0 : i32
    return %c0_i32, %c0_i32_0 : i32, i32
  }
  func.func @transform_6(%arg0: i32) -> (i32, i32) {
    %c0_i32 = arith.constant 0 : i32
    %c0_i32_0 = arith.constant 0 : i32
    %c0_i32_1 = arith.constant 0 : i32
    return %c0_i32, %c0_i32_0 : i32, i32
  }
  func.func @transform_7(%arg0: i32) -> (i32, i32) {
    %c0_i32 = arith.constant 0 : i32
    %c0_i32_0 = arith.constant 0 : i32
    return %arg0, %c0_i32 : i32, i32
  }
}

</mosaic_0001>

<bundles_post_ra>
// kernel: tpu_custom_call.1
= control target key start
LH: loop header
LB: loop body
LE: loop exit
PB: predicated region body
PF: predicated region fallthrough
CT: control target
= control target key end

     0   :  { %12 = vsyncpa [#allocation3], 0  ;;  %s852_s0 = inlined_call_operand.hbm [shape: bf16[16,128], index: 0, kind: input, shape index: {}]   ;;  %s853_s1 = inlined_call_operand.hbm [shape: bf16[128,128], index: 1, kind: input, shape index: {}]   ;;  %s854_s2 = inlined_call_operand.vmem [shape: f32[1,128], index: 2, kind: input, shape index: {}]   ;;  %s855_s3 = inlined_call_operand.hbm [shape: bf16[128,128], index: 3, kind: input, shape index: {}]   ;;  %s856_s4 = inlined_call_operand.vmem [shape: f32[1,128], index: 4, kind: input, shape index: {}]   ;;  %s857_s5 = inlined_call_operand.hbm [shape: bf16[128,128], index: 5, kind: input, shape index: {}]   ;;  %s858_s6 = inlined_call_operand.vmem [shape: f32[1,128], index: 6, kind: input, shape index: {}]   ;;  %s859_s7 = inlined_call_operand.hbm [shape: f32[16,128], index: 7, kind: output, shape index: {}]  }
   0x1   :  { %13 = vsyncpa [#allocation6], 0 }
   0x2   :  { %14 = vsyncpa [#allocation9], 0 }
   0x3   :  { %15 = vsyncpa [#allocation4], 0  ;;  %s735_s24 = smov [#allocation5]   ;;  %s736_s26 = smov [#allocation2]  }
   0x4   :  { %s33_s25 = sshll.u32 %s735_s24, 4  ;;  %s21_s27 = sshll.u32 %s736_s26, 4  ;;  %s34_s25 = int_to_ptr.vmem [resolvable:$true] %s33_s25  ;;  %s22_s27 = int_to_ptr.vmem [resolvable:$true] %s21_s27 }
   0x5   :  { %s635_s28 = scalar_lea.vmem %s34_s25, 1024  ;;  %p640_p1 = scmp.lt.s32.totalorder %s34_s25, %s34_s25 }
   0x6   :  { %p636_p0 = scmp.ne.s32.totalorder %s34_s25, %s635_s28  ;;  %p641_p2 = scmp.lt.s32.totalorder %s635_s28, %s635_s28 }
   0x8   :  { %p642_p3 = por %p641_p2, %p640_p1 }
   0xa   :  { %p643_p4 = pnand %p642_p3, %p636_p0 }
   0xc   :  { %646 = shalt.err (!%p643_p4)
}
   0xd   :  { %s737_s29 = smov 64   ;;  %s738_s30 = smov 4  }
   0xe   :  { %39 = dma.hbm_to_vmem [thread:$0]  %s853_s1, 1024, %s34_s25, [#allocation6], %s737_s29, %s737_s29, %s738_s30  }
   0xf   :  { %s655_s10 = scalar_lea.vmem %s22_s27, 128  ;;  %p660_p6 = scmp.lt.s32.totalorder %s22_s27, %s22_s27 }
  0x10   :  { %p656_p5 = scmp.ne.s32.totalorder %s22_s27, %s655_s10  ;;  %p661_p7 = scmp.lt.s32.totalorder %s655_s10, %s655_s10 }
  0x12   :  { %p662_p8 = por %p661_p7, %p660_p6 }
  0x14   :  { %p663_p9 = pnand %p662_p8, %p656_p5 }
  0x16   :  { %666 = shalt.err (!%p663_p9)
}
  0x17   :  { %27 = dma.hbm_to_vmem [thread:$0]  %s852_s0, 128, %s22_s27, [#allocation3], %s737_s29, %s737_s29, %s738_s30  }
  0x18   :  { %s739_s13 = smov [#allocation7]   ;;  %s740_s15 = smov [#allocation8]  }
  0x19   :  { %s47_s14 = sshll.u32 %s739_s13, 4  ;;  %s61_s16 = sshll.u32 %s740_s15, 4  ;;  %s48_s14 = int_to_ptr.vmem [resolvable:$true] %s47_s14  ;;  %s62_s16 = int_to_ptr.vmem [resolvable:$true] %s61_s16 }
  0x1a   :  { %s675_s1 = scalar_lea.vmem %s48_s14, 1024  ;;  %p680_p11 = scmp.lt.s32.totalorder %s48_s14, %s48_s14 }
  0x1b   :  { %p676_p10 = scmp.ne.s32.totalorder %s48_s14, %s675_s1  ;;  %p681_p12 = scmp.lt.s32.totalorder %s675_s1, %s675_s1 }
  0x1d   :  { %p682_p13 = por %p681_p12, %p680_p11 }
  0x1f   :  { %p683_p0 = pnand %p682_p13, %p676_p10 }
  0x21   :  { %686 = shalt.err (!%p683_p0)
}
  0x22   :  { %53 = dma.hbm_to_vmem [thread:$0]  %s855_s3, 1024, %s48_s14, [#allocation6], %s737_s29, %s737_s29, %s738_s30  }
  0x23   :  { %s695_s0 = scalar_lea.vmem %s62_s16, 1024  ;;  %p700_p2 = scmp.lt.s32.totalorder %s62_s16, %s62_s16 }
  0x24   :  { %p696_p1 = scmp.ne.s32.totalorder %s62_s16, %s695_s0  ;;  %p701_p3 = scmp.lt.s32.totalorder %s695_s0, %s695_s0 }
  0x26   :  { %p702_p4 = por %p701_p3, %p700_p2 }
  0x28   :  { %p703_p5 = pnand %p702_p4, %p696_p1 }
  0x2a   :  { %706 = shalt.err (!%p703_p5)
}
  0x2b   :  { %67 = dma.hbm_to_vmem [thread:$0]  %s857_s5, 1024, %s62_s16, [#allocation9], %s737_s29, %s737_s29, %s738_s30  }
  0x2c   :  { %727 = dma.done.wait [#allocation3], 128  }
  0x2d   :  { %728 = vsyncadd [#allocation3], 4294967168 }
  0x2e   :  { %729 = dma.done.wait [#allocation6], 2048  }
  0x2f   :  { %730 = vsyncadd [#allocation6], 4294965248 }
  0x30   :  { %731 = dma.done.wait [#allocation9], 1024  }
  0x31   :  { %732 = vsyncadd [#allocation9], 4294966272  ;;  %v741_v0 = vmov 0.0   ;;  %vm742_vm0 = vmmov 0   ;;  %v594_v1 = vld [vmem:[#allocation5 + $0x38] sm:$0xff]   ;;  %v595_v2 = vld [vmem:[#allocation5 + $0x30] sm:$0xff]  }
  0x32   :  { %523 = vmatprep.subr.bf16.mxu0 %v741_v0  ;;  %539 = vmatprep.mubr.msk.bf16.mxu0 %vm742_vm0, %v741_v0  ;;  %v596_v3 = vld [vmem:[#allocation5 + $0x28] sm:$0xff]   ;;  %v603_v4 = vld [vmem:[#allocation7 + $0x38] sm:$0xff]   ;;  %v597_v5 = vld [vmem:[#allocation5 + $0x20] sm:$0xff]  }
  0x33   :  { %543 = vmatprep.subr.bf16.mxu1 %v741_v0  ;;  %559 = vmatprep.mubr.msk.bf16.mxu1 %vm742_vm0, %v741_v0  ;;  %v604_v6 = vld [vmem:[#allocation7 + $0x30] sm:$0xff]   ;;  %v598_v7 = vld [vmem:[#allocation5 + $0x18] sm:$0xff]   ;;  %v605_v8 = vld [vmem:[#allocation7 + $0x28] sm:$0xff]  }
  0x34   :  { %524 = vmatpush3.bf16.msra.mxu0 %v594_v1  ;;  %544 = vmatpush3.bf16.msra.mxu1 %v603_v4  ;;  %v599_v9 = vld [vmem:[#allocation5 + $0x10] sm:$0xff]   ;;  %v606_v10 = vld [vmem:[#allocation7 + $0x20] sm:$0xff]   ;;  %v600_v11 = vld [vmem:[#allocation5 + $0x8] sm:$0xff]  }
  0x35   :  { %525 = vmatprep.subr.bf16.mxu0 %v741_v0  ;;  %545 = vmatprep.subr.bf16.mxu1 %v741_v0  ;;  %v607_v12 = vld [vmem:[#allocation7 + $0x18] sm:$0xff]   ;;  %v601_v13 = vld [vmem:[#allocation5] sm:$0xff]   ;;  %v608_v15 = vld [vmem:[#allocation7 + $0x10] sm:$0xff]  }
  0x36   :  { %v602_v14 = vld [vmem:[#allocation2] sm:$0xff]   ;;  %v609_v16 = vld [vmem:[#allocation7 + $0x8] sm:$0xff]   ;;  %v610_v17 = vld [vmem:[#allocation7] sm:$0xff]  }
  0x37   :  { %v611_v18 = vld [vmem:[#allocation8 + $0x38] sm:$0xff]   ;;  %v612_v19 = vld [vmem:[#allocation8 + $0x30] sm:$0xff]   ;;  %v613_v20 = vld [vmem:[#allocation8 + $0x28] sm:$0xff]  }
  0x38   :  { %526 = vmatpush3.bf16.msra.mxu0 %v595_v2  ;;  %546 = vmatpush3.bf16.msra.mxu1 %v604_v6  ;;  %v614_v21 = vld [vmem:[#allocation8 + $0x20] sm:$0xff]   ;;  %v615_v22 = vld [vmem:[#allocation8 + $0x18] sm:$0xff]   ;;  %v616_v33 = vld [vmem:[#allocation8 + $0x10] sm:$0xff]  }
  0x39   :  { %527 = vmatprep.subr.bf16.mxu0 %v741_v0  ;;  %547 = vmatprep.subr.bf16.mxu1 %v741_v0  ;;  %v466_v23 = vld [vmem:[%s854_s2] ss:$0 sm:$0xff]  ;;  %v617_v34 = vld [vmem:[#allocation8 + $0x8] sm:$0xff]   ;;  %v618_v35 = vld [vmem:[#allocation8] sm:$0xff]  }
  0x3a   :  { %v476_v36 = vld [vmem:[%s856_s4] ss:$0 sm:$0xff]  ;;  %s743_s4 = smov [#allocation10]  }
  0x3b   :  { %v485_v46 = vld [vmem:[%s858_s6] ss:$0 sm:$0xff]  ;;  %s452_s24 = sshll.u32 %s743_s4, 4  ;;  %s453_s24 = int_to_ptr.vmem [resolvable:$true] %s452_s24 }
  0x3c   :  { %528 = vmatpush3.bf16.msra.mxu0 %v596_v3  ;;  %548 = vmatpush3.bf16.msra.mxu1 %v605_v8  ;;  %s707_s6 = scalar_lea.vmem %s453_s24, 256  ;;  %p712_p7 = scmp.lt.s32.totalorder %s453_s24, %s453_s24 }
  0x3d   :  { %529 = vmatprep.subr.bf16.mxu0 %v741_v0  ;;  %549 = vmatprep.subr.bf16.mxu1 %v741_v0  ;;  %p708_p6 = scmp.ne.s32.totalorder %s453_s24, %s707_s6  ;;  %p713_p8 = scmp.lt.s32.totalorder %s707_s6, %s707_s6 }
  0x3f   :  { %p714_p9 = por %p713_p8, %p712_p7 }
  0x40   :  { %530 = vmatpush3.bf16.msra.mxu0 %v597_v5  ;;  %550 = vmatpush3.bf16.msra.mxu1 %v606_v10 }
  0x41   :  { %531 = vmatprep.subr.bf16.mxu0 %v741_v0  ;;  %551 = vmatprep.subr.bf16.mxu1 %v741_v0  ;;  %p715_p10 = pnand %p714_p9, %p708_p6 }
  0x44   :  { %532 = vmatpush3.bf16.msra.mxu0 %v598_v7  ;;  %552 = vmatpush3.bf16.msra.mxu1 %v607_v12 }
  0x45   :  { %533 = vmatprep.subr.bf16.mxu0 %v741_v0  ;;  %553 = vmatprep.subr.bf16.mxu1 %v741_v0 }
  0x48   :  { %534 = vmatpush3.bf16.msra.mxu0 %v599_v9  ;;  %554 = vmatpush3.bf16.msra.mxu1 %v608_v15 }
  0x49   :  { %535 = vmatprep.subr.bf16.mxu0 %v741_v0  ;;  %555 = vmatprep.subr.bf16.mxu1 %v741_v0 }
  0x4c   :  { %536 = vmatpush3.bf16.msra.mxu0 %v600_v11  ;;  %556 = vmatpush3.bf16.msra.mxu1 %v609_v16 }
  0x4d   :  { %537 = vmatprep.subr.bf16.mxu0 %v741_v0  ;;  %557 = vmatprep.subr.bf16.mxu1 %v741_v0 }
  0x50   :  { %538 = vmatpush3.bf16.msra.mxu0 %v601_v13  ;;  %558 = vmatpush3.bf16.msra.mxu1 %v610_v17 }
  0x51   :  { %563 = vmatprep.subr.bf16.mxu0 %v741_v0 }
  0x53   :  { %540 = vmatmul.mubr.bf16.vlgmr.msra.gmra.mxu0 %v602_v14 }
  0x54   :  { %579 = vmatprep.mubr.msk.bf16.mxu0 %vm742_vm0, %v741_v0  ;;  %564 = vmatpush3.bf16.msra.mxu0 %v611_v18 }
  0x55   :  { %565 = vmatprep.subr.bf16.mxu0 %v741_v0 }
  0x58   :  { %566 = vmatpush3.bf16.msra.mxu0 %v612_v19 }
  0x59   :  { %567 = vmatprep.subr.bf16.mxu0 %v741_v0 }
  0x5c   :  { %568 = vmatpush3.bf16.msra.mxu0 %v613_v20 }
  0x5d   :  { %569 = vmatprep.subr.bf16.mxu0 %v741_v0 }
  0x60   :  { %570 = vmatpush3.bf16.msra.mxu0 %v614_v21 }
  0x61   :  { %571 = vmatprep.subr.bf16.mxu0 %v741_v0 }
  0x64   :  { %572 = vmatpush3.bf16.msra.mxu0 %v615_v22 }
  0x65   :  { %573 = vmatprep.subr.bf16.mxu0 %v741_v0 }
  0x68   :  { %574 = vmatpush3.bf16.msra.mxu0 %v616_v33 }
  0x69   :  { %575 = vmatprep.subr.bf16.mxu0 %v741_v0 }
  0x6c   :  { %576 = vmatpush3.bf16.msra.mxu0 %v617_v34 }
  0x6d   :  { %577 = vmatprep.subr.bf16.mxu0 %v741_v0 }
  0x70   :  { %578 = vmatpush3.bf16.msra.mxu0 %v618_v35 }
 0x113   :  { %v196_v24 = vpop.f32.mrf.mxu0 }
 0x114   :  { %v197_v26 = vadd.f32 %v466_v23, %v196_v24 }
 0x115   :  { %v541_v25 = vpop.f32.mrf.mxu0 }
 0x116   :  { %v203_v30 = vmax.f32 %v197_v26, 0.0 }
 0x117   :  { %v199_v27 = vpop.f32.mrf.mxu0 }
 0x118   :  { %v200_v28 = vadd.f32 %v466_v23, %v199_v27 }
 0x119   :  { %v542_v29 = vpop.f32.mrf.mxu0 }
 0x11a   :  { %v204_v31 = vmax.f32 %v200_v28, 0.0 }
 0x11c   :  { %v205_v32 = vpack.c.bf16 %v204_v31, %v203_v30 }
 0x11e   :  { %560 = vmatmul.mubr.bf16.vlgmr.msra.gmra.mxu1 %v205_v32 }
 0x1de   :  { %v311_v37 = vpop.f32.mrf.mxu1 }
 0x1df   :  { %v312_v39 = vadd.f32 %v476_v36, %v311_v37 }
 0x1e0   :  { %v561_v38 = vpop.f32.mrf.mxu1 }
 0x1e1   :  { %v318_v43 = vmax.f32 %v312_v39, 0.0 }
 0x1e2   :  { %v314_v40 = vpop.f32.mrf.mxu1 }
 0x1e3   :  { %v315_v41 = vadd.f32 %v476_v36, %v314_v40 }
 0x1e4   :  { %v562_v42 = vpop.f32.mrf.mxu1 }
 0x1e5   :  { %v319_v44 = vmax.f32 %v315_v41, 0.0 }
 0x1e7   :  { %v320_v45 = vpack.c.bf16 %v319_v44, %v318_v43 }
 0x1e9   :  { %580 = vmatmul.mubr.bf16.vlgmr.msra.gmra.mxu0 %v320_v45 }
 0x2a9   :  { %v426_v47 = vpop.f32.mrf.mxu0 }
 0x2aa   :  { %v427_v48 = vadd.f32 %v485_v46, %v426_v47 }
 0x2ab   :  { %v581_v49 = vpop.f32.mrf.mxu0 }
 0x2ac   :  { %v494_v50 = vmul.f32 -1.442695, %v427_v48 }
 0x2ad   :  { %v429_v51 = vpop.f32.mrf.mxu0 }
 0x2ae   :  { %619 = vpow2.f32 %v494_v50  ;;  %v430_v52 = vadd.f32 %v485_v46, %v429_v51 }
 0x2af   :  { %v582_v53 = vpop.f32.mrf.mxu0 }
 0x2b0   :  { %v495_v54 = vmul.f32 -1.442695, %v430_v52 }
 0x2b2   :  { %621 = vpow2.f32 %v495_v54 }
 0x2bb   :  { %v620_v55 = vpop.eup %619 }
 0x2bc   :  { %v439_v56 = vadd.f32 1.0, %v620_v55 }
 0x2be   :  { %623 = vrcp.f32 %v439_v56 }
 0x2bf   :  { %v622_v57 = vpop.eup %621 }
 0x2c0   :  { %v440_v58 = vadd.f32 1.0, %v622_v57 }
 0x2c2   :  { %625 = vrcp.f32 %v440_v58 }
 0x2cb   :  { %v624_v59 = vpop.eup %623 }
 0x2cc   :  { %445 = vst [vmem:[#allocation10] sm:$0xff] %v624_v59 }
 0x2cf   :  { %v626_v60 = vpop.eup %625 }
 0x2d0   :  { %446 = vst [vmem:[#allocation10 + $0x8] sm:$0xff] %v626_v60 }
 0x2d1   :  { %718 = shalt.err (!%p715_p10)
}
 0x2d2   :  { %s744_s25 = smov 128   ;;  %s745_s26 = smov 8  }
 0x2d3   :  { %458 = dma.vmem_to_hbm [thread:$0]  %s453_s24, 256, %s859_s7, [#allocation4], %s744_s25, %s744_s25, %s745_s26  }
 0x2d4   :  { %733 = dma.done.wait [#allocation4], 256  }
 0x2d5   :  { %734 = vsyncadd [#allocation4], 4294967040 }
 0x2d6   :  { %462 = vsyncpa [#allocation3], 1 }
 0x2d7   :  { %463 = vsyncpa [#allocation6], 1 }
 0x2d8   :  { %464 = vsyncpa [#allocation9], 1 }
 0x2d9   :  { %465 = vsyncpa [#allocation4], 1 }

</bundles_post_ra>
